<compile_context>
chip_gen: v7x
topology: tpu7x:2x2x1
jax: 0.10.0
libtpu: 0.0.40
codegen_flags: <defaults>
</compile_context>

<pallas_src>
import jax
import jax.numpy as jnp
from jax.experimental import pallas as pl
from jax.experimental.pallas import tpu as pltpu


# ---------------------------------------------------------------------------
# Kernel
# ---------------------------------------------------------------------------
def _affine_kernel(sb_ref, x_ref, o_ref):
    """y = x * scale + bias.  scale/bias are runtime SMEM scalars."""
    scale = sb_ref[0]
    bias = sb_ref[1]
    x = x_ref[...].astype(jnp.float32)          # compute in f32 (free, HBM-bound)
    o_ref[...] = (x * scale + bias).astype(o_ref.dtype)


# ---------------------------------------------------------------------------
# Tiling helpers
# ---------------------------------------------------------------------------
_SUBLANE = {4: 8, 2: 16, 1: 32}      # itemsize -> sublane packing
_PER_TILE_TARGET = 6 << 20           # ~6 MiB tiles: at the measured HBM roofline plateau
_MIN_GRID_STEPS = 8                  # keep pipelining + v7x 2-core balance
_MAX_LANES = 8192                    # lane-width cap for the lane-dense view


def _vmem_capacity_bytes() -> int:
    try:
        return int(pltpu.get_tpu_info().vmem_capacity_bytes)
    except Exception:
        return 64 << 20              # conservative fallback: v7x per-TensorCore VMEM


def _lane_dense_view(M: int, N: int):
    """Largest (rows, lanes) row-major reinterpretation with lanes % 128 == 0."""
    total = M * N
    if total % 128 != 0:
        return None
    kmax = min(_MAX_LANES // 128, total // 128)
    for k in range(kmax, 0, -1):
        if total % (128 * k) == 0:
            return total // (128 * k), 128 * k
    return None                      # unreachable: k == 1 always divides


def _row_tile(M: int, row_bytes: int, sub: int, per_tile_max: int) -> int:
    """Sublane-aligned row-slab height: bytes-capped, with >= a few grid steps."""
    tm = max(sub, per_tile_max // max(row_bytes, 1))
    # Never collapse the grid to one step when the row count allows splitting:
    # software pipelining needs >= 2 steps; v7x megacore wants >= 2 per core.
    if M >= 2 * sub:
        steps = min(_MIN_GRID_STEPS, M // sub)
        tm = min(tm, max(sub, (M // steps) // sub * sub))
    tm = max(sub, (tm // sub) * sub)
    if tm >= M:
        tm = M                       # full dim -> always a legal block shape
    return tm


# ---------------------------------------------------------------------------
# Forward
# ---------------------------------------------------------------------------
@jax.jit
def linear_forward(x: jax.Array, scale_bias: jax.Array) -> jax.Array:
    """y = x * scale_bias[0] + scale_bias[1] via a Pallas TPU kernel. x must be 2D."""
    assert x.ndim == 2, f"Expected 2D input tensor, got {x.ndim}D"
    M, N = x.shape
    itemsize = x.dtype.itemsize
    sub = _SUBLANE.get(itemsize, 8)

    vmem_bytes = _vmem_capacity_bytes()                       # trace-time, per-generation
    per_tile_max = min(_PER_TILE_TARGET, max(vmem_bytes // 8, 1 << 20))

    view = _lane_dense_view(M, N)
    if view is not None:
        # Lane-dense path: reinterpret the contiguous row-major buffer as (R, W)
        # with W a large multiple of 128 -> unmasked vst stores for any N.
        R, W = view
        x2, work_shape = x.reshape(R, W), (R, W)
        tm, tn = _row_tile(R, W * itemsize, sub, per_tile_max), W
    else:
        # Element count not a multiple of 128: stream (M, N) directly
        # (masked stores on the ragged lane edge; correctness path, small sizes).
        x2, work_shape = x, (M, N)
        if N * itemsize * sub <= per_tile_max:
            tn = N                                            # full dim -> legal block
        else:
            tn = max(128, (per_tile_max // (sub * itemsize)) // 128 * 128)
            if tn >= N:
                tn = N
        tm = _row_tile(M, tn * itemsize, sub, per_tile_max)

    Rr, Cc = work_shape
    if tn == Cc:
        grid = (pl.cdiv(Rr, tm),)
        spec = pl.BlockSpec((tm, tn), lambda i: (i, 0))
        semantics = ("parallel",)
    else:
        grid = (pl.cdiv(Rr, tm), pl.cdiv(Cc, tn))
        spec = pl.BlockSpec((tm, tn), lambda i, j: (i, j))
        semantics = ("parallel", "parallel")

    tile_bytes = tm * tn * itemsize
    # Double-buffered in+out tiles (+ headroom); stay near the 32 MiB default
    # and well under the 64 MiB physical VMEM of a v7x TensorCore.
    vmem_limit = max(32 << 20, 4 * tile_bytes + (8 << 20))
    vmem_limit = int(min(vmem_limit, 48 << 20, vmem_bytes * 3 // 4))

    out = pl.pallas_call(
        _affine_kernel,
        out_shape=jax.ShapeDtypeStruct(work_shape, x.dtype),
        grid=grid,
        in_specs=[pl.BlockSpec(memory_space=pltpu.MemorySpace.SMEM), spec],
        out_specs=spec,
        compiler_params=pltpu.CompilerParams(
            dimension_semantics=semantics,
            vmem_limit_bytes=vmem_limit),
    )(scale_bias, x2)
    # TODO(synk): enable input_output_aliases={1: 0} when the caller donates x.
    return out.reshape(M, N)


class Linear:
    """JAX/Pallas equivalent of the PyTorch `Linear` module (scalar affine op)."""

    def __init__(self, scale: float = 1.0, bias: float = 0.0):
        self.scale = float(scale)
        self.bias = float(bias)
        # Runtime scalars (SMEM operand): new scale/bias values never recompile.
        self._scale_bias = jnp.array([self.scale, self.bias], dtype=jnp.float32)

    def __call__(self, x: jax.Array) -> jax.Array:
        # TODO(synk): backward (grad_input = grad_output * scale) not implemented;
        # forward-only to match the task.
        return linear_forward(x, self._scale_bias)


if __name__ == "__main__":
    key = jax.random.PRNGKey(0)
    k1, k2, k3, k4 = jax.random.split(key, 4)

    scale, bias = 2.5, -0.75
    mod = Linear(scale=scale, bias=bias)

    # f32, 128-aligned: lane-dense reshape path (single tile at this tiny size).
    x32 = jax.random.normal(k1, (16, 256), dtype=jnp.float32)
    y32 = jax.block_until_ready(mod(x32))
    assert y32.shape == x32.shape and y32.dtype == x32.dtype
    assert jnp.allclose(y32, x32 * scale + bias, atol=1e-6, rtol=1e-6)

    # f32, larger: exercises the multi-step pipelined 1D grid.
    xl = jax.random.normal(k2, (256, 512), dtype=jnp.float32)
    yl = jax.block_until_ready(mod(xl))
    assert jnp.allclose(yl, xl * scale + bias, atol=1e-6, rtol=1e-6)

    # bf16: FMA computed in f32 inside the kernel, cast back on store.
    xbf = jax.random.normal(k3, (32, 384), dtype=jnp.bfloat16)
    ybf = jax.block_until_ready(mod(xbf))
    assert ybf.shape == xbf.shape and ybf.dtype == xbf.dtype
    ref_bf = (xbf.astype(jnp.float32) * scale + bias).astype(jnp.bfloat16)
    assert jnp.allclose(ybf.astype(jnp.float32), ref_bf.astype(jnp.float32),
                        atol=1e-2, rtol=1e-2)

    # Non-128-divisible element count: odd-size fallback path (full-dim blocks).
    xod = jax.random.normal(k4, (12, 200), dtype=jnp.float32)
    yod = jax.block_until_ready(mod(xod))
    assert jnp.allclose(yod, xod * scale + bias, atol=1e-6, rtol=1e-6)

    print("KERNEL_OK")
</pallas_src>

<mosaic_0001>
module attributes {stable_mosaic.version = 11 : i64} {
  func.func @_affine_kernel(%arg0: i32, %arg1: memref<2xf32, #tpu.memory_space<smem>>, %arg2: memref<1x4096xf32, #tpu.memory_space<vmem>>, %arg3: memref<1x4096xf32, #tpu.memory_space<vmem>>) attributes {dimension_semantics = [#tpu.dimension_semantics<parallel>], iteration_bounds = array<i64: 1>, scalar_prefetch = 0 : i64, scratch_operands = 0 : i64, tpu.core_type = #tpu.core_type<tc>, window_params = [{transform_indices = @transform_0, window_bounds = array<i64: 2>}, {transform_indices = @transform_1, window_bounds = array<i64: 1, 4096>}, {transform_indices = @transform_2, window_bounds = array<i64: 1, 4096>}]} {
    %c0 = arith.constant 0 : index
    %0 = memref.load %arg1[%c0] : memref<2xf32, #tpu.memory_space<smem>>
    %c1 = arith.constant 1 : index
    %1 = memref.load %arg1[%c1] : memref<2xf32, #tpu.memory_space<smem>>
    %c0_0 = arith.constant 0 : index
    %c0_1 = arith.constant 0 : index
    %2 = vector.load %arg2[%c0_0, %c0_1] : memref<1x4096xf32, #tpu.memory_space<vmem>>, vector<1x4096xf32>
    %3 = vector.broadcast %0 : f32 to vector<1x4096xf32>
    %4 = arith.mulf %2, %3 : vector<1x4096xf32>
    %5 = vector.broadcast %1 : f32 to vector<1x4096xf32>
    %6 = arith.addf %4, %5 : vector<1x4096xf32>
    %c0_2 = arith.constant 0 : index
    %c0_3 = arith.constant 0 : index
    %7 = vector.load %arg3[%c0_2, %c0_3] : memref<1x4096xf32, #tpu.memory_space<vmem>>, vector<1x4096xf32>
    tpu.vector_store %arg3[%c0_2, %c0_3], %6 {strides = array<i32>} : memref<1x4096xf32, #tpu.memory_space<vmem>>, vector<1x4096xf32>,
    return
  }
  func.func @transform_0(%arg0: i32) -> i32 {
    %c0_i32 = arith.constant 0 : i32
    %c0_i32_0 = arith.constant 0 : i32
    return %c0_i32 : i32
  }
  func.func @transform_1(%arg0: i32) -> (i32, i32) {
    %c0_i32 = arith.constant 0 : i32
    %c0_i32_0 = arith.constant 0 : i32
    return %arg0, %c0_i32 : i32, i32
  }
  func.func @transform_2(%arg0: i32) -> (i32, i32) {
    %c0_i32 = arith.constant 0 : i32
    %c0_i32_0 = arith.constant 0 : i32
    return %arg0, %c0_i32 : i32, i32
  }
}

</mosaic_0001>

<bundles_post_ra>
// kernel: linear_forward.1
= control target key start
LH: loop header
LB: loop body
LE: loop exit
PB: predicated region body
PF: predicated region fallthrough
CT: control target
= control target key end

     0   :  { %7 = vsyncpa [#allocation3], 0  ;;  %s108_s0 = inlined_call_operand.vmem [shape: f32[2], index: 0, kind: input, shape index: {}]   ;;  %s109_s1 = inlined_call_operand.vmem [shape: f32[1,4096], index: 1, kind: input, shape index: {}]   ;;  %s110_s2 = inlined_call_operand.vmem [shape: f32[1,4096], index: 2, kind: output, shape index: {}]  }
   0x1   :  { %s14_s11 = sshll.u32 %s108_s0, 4  ;;  %s15_s11 = int_to_ptr.vmem [resolvable:$true] %s14_s11 }
   0x2   :  { %s51_s12 = scalar_lea.vmem %s15_s11, 16  ;;  %p56_p1 = scmp.lt.s32.totalorder %s15_s11, %s15_s11 }
   0x3   :  { %p52_p0 = scmp.ne.s32.totalorder %s15_s11, %s51_s12  ;;  %p57_p2 = scmp.lt.s32.totalorder %s51_s12, %s51_s12 }
   0x5   :  { %p58_p3 = por %p57_p2, %p56_p1 }
   0x7   :  { %p59_p4 = pnand %p58_p3, %p52_p0 }
   0x9   :  { %62 = shalt.err (!%p59_p4)
}
   0xa   :  { %s65_s13 = smov [#allocation2]  }
   0xb   :  { %17 = dma.vmem_to_smem %s15_s11, 16, %s65_s13, [#allocation3]  }
   0xc   :  { %63 = dma.done.wait [#allocation3], 16  }
   0xd   :  { %64 = vsyncadd [#allocation3], 4294967280 }
   0xe   :  { %23 = sfence }
   0xf   :  { %s24_s14 = sld [smem:[#allocation2]]  ;;  %s49_s15 = sld [smem:[#allocation2 + $0x1]]  ;;  %v26_v0 = vld [vmem:[%s109_s1] sm:$0xff]  ;;  %v27_v1 = vld [vmem:[%s109_s1 + $0x8] sm:$0xff]  ;;  %v28_v2 = vld [vmem:[%s109_s1 + $0x10] sm:$0xff] }
  0x10   :  { %v29_v3 = vld [vmem:[%s109_s1 + $0x18] sm:$0xff] }
  0x15   :  { %v30_v4 = vstv %s24_s14  ;;  %v35_v5 = vstv %s49_s15 }
  0x16   :  { %v31_v6 = vmul.f32 %v30_v4, %v26_v0  ;;  %v32_v7 = vmul.f32 %v30_v4, %v27_v1  ;;  %v33_v8 = vmul.f32 %v30_v4, %v28_v2  ;;  %v34_v9 = vmul.f32 %v30_v4, %v29_v3 }
  0x18   :  { %v36_v10 = vadd.f32 %v35_v5, %v31_v6  ;;  %v37_v11 = vadd.f32 %v35_v5, %v32_v7  ;;  %v38_v12 = vadd.f32 %v35_v5, %v33_v8  ;;  %v39_v13 = vadd.f32 %v35_v5, %v34_v9 }
  0x1a   :  { %40 = vst [vmem:[%s110_s2] sm:$0xff] %v36_v10  ;;  %41 = vst [vmem:[%s110_s2 + $0x8] sm:$0xff] %v37_v11 }
  0x1b   :  { %42 = vst [vmem:[%s110_s2 + $0x10] sm:$0xff] %v38_v12  ;;  %43 = vst [vmem:[%s110_s2 + $0x18] sm:$0xff] %v39_v13 }
  0x1c   :  { %48 = vsyncpa [#allocation3], 1 }

</bundles_post_ra>
